<compile_context>
chip_gen: v7x
topology: tpu7x:2x2x1
jax: 0.10.0
libtpu: 0.0.40
codegen_flags: <defaults>
</compile_context>

<pallas_src>
import functools

import jax
import jax.numpy as jnp
from jax.experimental import pallas as pl
from jax.experimental.pallas import tpu as pltpu


HEAD_WIDTH = 128     # lane-dense fused critic+actor head width (>= num_actions + 1)
SCALARS_WIDTH = 8    # packed per-row scalar outputs: [value, log_prob, action, 0...]


def policy_act_kernel(obs_ref, h_ref, mask_ref,
                      w1_ref, b1_ref,
                      wih_ref, whh_ref, bi_ref, bhn_ref,
                      whead_ref, bhead_ref,
                      scalars_ref, hout_ref, *, num_actions):
    H = h_ref.shape[-1]
    bf16 = jnp.bfloat16

    # --- encoder MLP (bf16 MXU operands, f32 accumulate); cast done in-register ---
    x = jnp.dot(obs_ref[...].astype(bf16), w1_ref[...],
                preferred_element_type=jnp.float32) + b1_ref[...]
    x = jnp.maximum(x, 0.0)

    # --- GRU cell (torch.nn.GRUCell semantics), two accumulated K=H matmuls ---
    # masks reset the hidden state at episode starts.
    h_prev = h_ref[...] * mask_ref[...]
    gi = jnp.dot(x.astype(bf16), wih_ref[...],
                 preferred_element_type=jnp.float32) + bi_ref[...]
    gh = jnp.dot(h_prev.astype(bf16), whh_ref[...],
                 preferred_element_type=jnp.float32)
    r = jax.nn.sigmoid(gi[:, 0:H] + gh[:, 0:H])
    z = jax.nn.sigmoid(gi[:, H:2 * H] + gh[:, H:2 * H])
    n = jnp.tanh(gi[:, 2 * H:] + r * (gh[:, 2 * H:] + bhn_ref[...]))
    h_new = (1.0 - z) * n + z * h_prev
    hout_ref[...] = h_new

    # --- fused critic + actor head (cols [0, A) = logits, col A = value, rest pad) ---
    head = jnp.dot(h_new.astype(bf16), whead_ref[...],
                   preferred_element_type=jnp.float32) + bhead_ref[...]
    col = jax.lax.broadcasted_iota(jnp.int32, head.shape, 1)
    neg = jnp.float32(-1e30)

    value = jnp.sum(jnp.where(col == num_actions, head, 0.0), axis=-1, keepdims=True)
    logits = jnp.where(col < num_actions, head, neg)

    m = jnp.max(logits, axis=-1, keepdims=True)
    lse = m + jnp.log(jnp.sum(jnp.exp(logits - m), axis=-1, keepdims=True))
    alogp = m - lse                           # log_softmax gathered at the argmax action

    # deterministic action = argmax (first max index)
    cand = jnp.where(logits >= m, col, head.shape[-1])
    action_f = jnp.min(cand, axis=-1, keepdims=True).astype(jnp.float32)

    # --- small packed scalar slab (32 B/row): [value | log_prob | action | 0...] ---
    col8 = jax.lax.broadcasted_iota(jnp.int32, (head.shape[0], SCALARS_WIDTH), 1)
    scalars_ref[...] = jnp.where(col8 == 0, value,
                        jnp.where(col8 == 1, alogp,
                         jnp.where(col8 == 2, action_f, 0.0)))


def _choose_block_b(batch, requested):
    """Batch tile: multiple of 8, capped at `requested`, aim for >=4 grid steps so
    both v7x TensorCores get work and DMA/compute pipelining has something to overlap."""
    if batch <= 8:
        return batch
    target_steps = 4 if batch >= 32 else 2
    bb = min(requested, pl.cdiv(batch, target_steps))
    bb = max(8, (bb // 8) * 8)
    return min(bb, batch)


@functools.partial(jax.jit, static_argnames=("num_actions", "block_b"))
def policy_act(obs, rnn_h, masks, prepared, num_actions, block_b=512):
    B, D_obs = obs.shape
    H = rnn_h.shape[-1]

    bb = _choose_block_b(B, block_b)
    nblk = pl.cdiv(B, bb)
    # Ragged tail (B % bb != 0) handled by Pallas' partial last block: garbage rows are
    # computed but clipped on write-back and never read by the caller.

    batch_spec = lambda d: pl.BlockSpec((bb, d), lambda i: (i, 0))
    weight_spec = lambda shape: pl.BlockSpec(shape, lambda i: (0, 0))

    kernel = functools.partial(policy_act_kernel, num_actions=num_actions)

    scalars, h_out = pl.pallas_call(
        kernel,
        out_shape=(
            jax.ShapeDtypeStruct((B, SCALARS_WIDTH), jnp.float32),  # [value|logp|action|0..]
            jax.ShapeDtypeStruct((B, H), jnp.float32),              # rnn_hidden_states'
        ),
        grid=(nblk,),
        in_specs=[
            batch_spec(D_obs),                        # obs (f32, cast in-kernel)
            batch_spec(H),                            # rnn hidden (f32)
            batch_spec(1),                            # masks
            weight_spec(prepared["w1"].shape),        # W1 (bf16)
            weight_spec(prepared["b1"].shape),        # b1
            weight_spec(prepared["wih"].shape),       # GRU input weights (bf16)
            weight_spec(prepared["whh"].shape),       # GRU hidden weights (bf16)
            weight_spec(prepared["bi"].shape),        # fused gi-path biases
            weight_spec(prepared["bhn"].shape),       # hidden-path n bias
            weight_spec(prepared["whead"].shape),     # fused critic+actor weights (bf16)
            weight_spec(prepared["bhead"].shape),     # fused critic+actor biases
        ],
        out_specs=[batch_spec(SCALARS_WIDTH), batch_spec(H)],
        compiler_params=pltpu.CompilerParams(dimension_semantics=("parallel",)),
    )(obs, rnn_h, masks,
      prepared["w1"], prepared["b1"],
      prepared["wih"], prepared["whh"], prepared["bi"], prepared["bhn"],
      prepared["whead"], prepared["bhead"])

    value = scalars[:, 0:1]
    alogp = scalars[:, 1:2]
    action = scalars[:, 2:3].astype(jnp.int32)
    return value, action, alogp, h_out


def prepare_params(params):
    """Fuse / pad / quantize the raw f32 parameters into the kernel layout."""
    H = params["wih"].shape[0]
    A = params["wa"].shape[1]
    assert A + 1 <= HEAD_WIDTH
    bf16 = jnp.bfloat16
    bih, bhh = params["bih"], params["bhh"]

    # gi-path bias: [b_ir + b_hr | b_iz + b_hz | b_in]; gh-path keeps only b_hn (needed
    # separately because of the r * (Whn h + b_hn) term in GRUCell).
    bi = jnp.concatenate([bih[:, :2 * H] + bhh[:, :2 * H], bih[:, 2 * H:]], axis=1)  # (1,3H)
    bhn = bhh[:, 2 * H:]                                                             # (1, H)

    w_head = jnp.zeros((H, HEAD_WIDTH), jnp.float32)
    w_head = w_head.at[:, :A].set(params["wa"]).at[:, A].set(params["wv"][:, 0])
    b_head = jnp.zeros((1, HEAD_WIDTH), jnp.float32)
    b_head = b_head.at[:, :A].set(params["ba"]).at[:, A].set(params["bv"][:, 0])

    return {
        "w1": params["w1"].astype(bf16),
        "b1": params["b1"],
        "wih": params["wih"].astype(bf16),
        "whh": params["whh"].astype(bf16),
        "bi": bi,
        "bhn": bhn,
        "whead": w_head.astype(bf16),
        "bhead": b_head,
    }


def policy_act_ref(obs, rnn_h, masks, params):
    """Pure-JAX reference (same bf16 MXU-operand quantization, f32 accumulation)."""
    H = rnn_h.shape[-1]
    bf16 = jnp.bfloat16
    mm = lambda a, w: jnp.dot(a.astype(bf16), w.astype(bf16),
                              preferred_element_type=jnp.float32)
    x = jnp.maximum(mm(obs, params["w1"]) + params["b1"], 0.0)
    h_prev = rnn_h * masks
    gi = mm(x, params["wih"]) + params["bih"]
    gh = mm(h_prev, params["whh"]) + params["bhh"]
    r = jax.nn.sigmoid(gi[:, :H] + gh[:, :H])
    z = jax.nn.sigmoid(gi[:, H:2 * H] + gh[:, H:2 * H])
    n = jnp.tanh(gi[:, 2 * H:] + r * gh[:, 2 * H:])
    h_new = (1.0 - z) * n + z * h_prev
    value = mm(h_new, params["wv"]) + params["bv"]
    logits = mm(h_new, params["wa"]) + params["ba"]
    logp = jax.nn.log_softmax(logits, axis=-1)
    action = jnp.argmax(logits, axis=-1, keepdims=True).astype(jnp.int32)
    alogp = jnp.take_along_axis(logp, action, axis=-1)
    return value, action, alogp, h_new


def init_params(key, d_obs, hidden, num_actions):
    ks = jax.random.split(key, 8)
    s = lambda fan_in: 1.0 / jnp.sqrt(fan_in)
    return {
        "w1":  jax.random.normal(ks[0], (d_obs, hidden), jnp.float32) * s(d_obs),
        "b1":  jnp.zeros((1, hidden), jnp.float32),
        "wih": jax.random.normal(ks[1], (hidden, 3 * hidden), jnp.float32) * s(hidden),
        "whh": jax.random.normal(ks[2], (hidden, 3 * hidden), jnp.float32) * s(hidden),
        "bih": jax.random.normal(ks[3], (1, 3 * hidden), jnp.float32) * 0.01,
        "bhh": jax.random.normal(ks[4], (1, 3 * hidden), jnp.float32) * 0.01,
        "wv":  jax.random.normal(ks[5], (hidden, 1), jnp.float32) * s(hidden),
        "bv":  jnp.zeros((1, 1), jnp.float32),
        "wa":  jax.random.normal(ks[6], (hidden, num_actions), jnp.float32) * s(hidden),
        "ba":  jnp.zeros((1, num_actions), jnp.float32),
    }


if __name__ == "__main__":
    # Small shapes; B deliberately NOT a multiple of 8 to exercise the in-kernel ragged
    # tail (no wrapper-side padding pass) and a multi-step grid for the "parallel" axis.
    B, D_OBS, HIDDEN, NUM_ACTIONS = 22, 40, 128, 6

    key = jax.random.PRNGKey(0)
    k_obs, k_h, k_p = jax.random.split(key, 3)

    obs = jax.random.normal(k_obs, (B, D_OBS), jnp.float32)
    rnn_h = jax.random.normal(k_h, (B, HIDDEN), jnp.float32)
    # masks: zero for the first half of the batch (episode boundaries), one otherwise
    masks = jnp.concatenate(
        [jnp.zeros((B // 2, 1), jnp.float32),
         jnp.ones((B - B // 2, 1), jnp.float32)], axis=0)
    params = init_params(k_p, D_OBS, HIDDEN, NUM_ACTIONS)
    prepared = prepare_params(params)

    value, action, alogp, h_new = policy_act(
        obs, rnn_h, masks, prepared, num_actions=NUM_ACTIONS)
    jax.block_until_ready((value, action, alogp, h_new))

    v_ref, a_ref, lp_ref, h_ref = policy_act_ref(obs, rnn_h, masks, params)
    assert jnp.allclose(value, v_ref, atol=1e-2), "value mismatch"
    assert jnp.array_equal(action, a_ref), "action mismatch"
    assert jnp.allclose(alogp, lp_ref, atol=1e-2), "log-prob mismatch"
    assert jnp.allclose(h_new, h_ref, atol=1e-2), "hidden-state mismatch"

    # TODO(synk): stochastic sampling path (distribution.sample()), DiagGaussian /
    # MultiDiscrete heads, stddev annealing, and optional bf16-carried hidden state
    # are not implemented; kernel covers the deterministic Discrete act() path only.
    print("KERNEL_OK")
</pallas_src>

<mosaic_0001>
module attributes {stable_mosaic.version = 11 : i64} {
  func.func @policy_act_kernel(%arg0: i32, %arg1: memref<8x40xf32, #tpu.memory_space<vmem>>, %arg2: memref<8x128xf32, #tpu.memory_space<vmem>>, %arg3: memref<8x1xf32, #tpu.memory_space<vmem>>, %arg4: memref<40x128xbf16, #tpu.memory_space<vmem>>, %arg5: memref<1x128xf32, #tpu.memory_space<vmem>>, %arg6: memref<128x384xbf16, #tpu.memory_space<vmem>>, %arg7: memref<128x384xbf16, #tpu.memory_space<vmem>>, %arg8: memref<1x384xf32, #tpu.memory_space<vmem>>, %arg9: memref<1x128xf32, #tpu.memory_space<vmem>>, %arg10: memref<128x128xbf16, #tpu.memory_space<vmem>>, %arg11: memref<1x128xf32, #tpu.memory_space<vmem>>, %arg12: memref<8x8xf32, #tpu.memory_space<vmem>>, %arg13: memref<8x128xf32, #tpu.memory_space<vmem>>) attributes {dimension_semantics = [#tpu.dimension_semantics<parallel>], iteration_bounds = array<i64: 3>, scalar_prefetch = 0 : i64, scratch_operands = 0 : i64, tpu.core_type = #tpu.core_type<tc>, window_params = [{transform_indices = @transform_0, window_bounds = array<i64: 8, 40>}, {transform_indices = @transform_1, window_bounds = array<i64: 8, 128>}, {transform_indices = @transform_2, window_bounds = array<i64: 8, 1>}, {pipeline_mode = #tpu.pipeline_mode<synchronous>, transform_indices = @transform_3, window_bounds = array<i64: 40, 128>}, {pipeline_mode = #tpu.pipeline_mode<synchronous>, transform_indices = @transform_4, window_bounds = array<i64: 1, 128>}, {pipeline_mode = #tpu.pipeline_mode<synchronous>, transform_indices = @transform_5, window_bounds = array<i64: 128, 384>}, {pipeline_mode = #tpu.pipeline_mode<synchronous>, transform_indices = @transform_6, window_bounds = array<i64: 128, 384>}, {pipeline_mode = #tpu.pipeline_mode<synchronous>, transform_indices = @transform_7, window_bounds = array<i64: 1, 384>}, {pipeline_mode = #tpu.pipeline_mode<synchronous>, transform_indices = @transform_8, window_bounds = array<i64: 1, 128>}, {pipeline_mode = #tpu.pipeline_mode<synchronous>, transform_indices = @transform_9, window_bounds = array<i64: 128, 128>}, {pipeline_mode = #tpu.pipeline_mode<synchronous>, transform_indices = @transform_10, window_bounds = array<i64: 1, 128>}, {transform_indices = @transform_11, window_bounds = array<i64: 8, 8>}, {transform_indices = @transform_12, window_bounds = array<i64: 8, 128>}]} {
    %c0 = arith.constant 0 : index
    %c0_0 = arith.constant 0 : index
    %0 = vector.load %arg1[%c0, %c0_0] : memref<8x40xf32, #tpu.memory_space<vmem>>, vector<8x40xf32>
    %1 = arith.truncf %0 : vector<8x40xf32> to vector<8x40xbf16>
    %c0_1 = arith.constant 0 : index
    %c0_2 = arith.constant 0 : index
    %2 = vector.load %arg4[%c0_1, %c0_2] : memref<40x128xbf16, #tpu.memory_space<vmem>>, vector<40x128xbf16>
    %cst = arith.constant dense<0.000000e+00> : vector<8x128xf32>
    %3 = tpu.matmul %1, %2, %cst {dimension_numbers = #tpu.dot_dimension_numbers<[1], [0], [0], [1], [0, 0, 1, 1], [], []>} : vector<8x40xbf16>, vector<40x128xbf16>, vector<8x128xf32> -> vector<8x128xf32>
    %c0_3 = arith.constant 0 : index
    %c0_4 = arith.constant 0 : index
    %4 = vector.load %arg5[%c0_3, %c0_4] : memref<1x128xf32, #tpu.memory_space<vmem>>, vector<1x128xf32>
    %5 = vector.broadcast %4 : vector<1x128xf32> to vector<8x128xf32>
    %6 = arith.addf %3, %5 : vector<8x128xf32>
    %cst_5 = arith.constant 0.000000e+00 : f32
    %7 = vector.broadcast %cst_5 : f32 to vector<8x128xf32>
    %8 = arith.maximumf %6, %7 : vector<8x128xf32>
    %c0_6 = arith.constant 0 : index
    %c0_7 = arith.constant 0 : index
    %9 = vector.load %arg2[%c0_6, %c0_7] : memref<8x128xf32, #tpu.memory_space<vmem>>, vector<8x128xf32>
    %c0_8 = arith.constant 0 : index
    %c0_9 = arith.constant 0 : index
    %10 = vector.load %arg3[%c0_8, %c0_9] : memref<8x1xf32, #tpu.memory_space<vmem>>, vector<8x1xf32>
    %11 = vector.broadcast %10 : vector<8x1xf32> to vector<8x128xf32>
    %12 = arith.mulf %9, %11 : vector<8x128xf32>
    %13 = arith.truncf %8 : vector<8x128xf32> to vector<8x128xbf16>
    %c0_10 = arith.constant 0 : index
    %c0_11 = arith.constant 0 : index
    %14 = vector.load %arg6[%c0_10, %c0_11] : memref<128x384xbf16, #tpu.memory_space<vmem>>, vector<128x384xbf16>
    %cst_12 = arith.constant dense<0.000000e+00> : vector<8x384xf32>
    %15 = tpu.matmul %13, %14, %cst_12 {dimension_numbers = #tpu.dot_dimension_numbers<[1], [0], [0], [1], [0, 0, 1, 1], [], []>} : vector<8x128xbf16>, vector<128x384xbf16>, vector<8x384xf32> -> vector<8x384xf32>
    %c0_13 = arith.constant 0 : index
    %c0_14 = arith.constant 0 : index
    %16 = vector.load %arg8[%c0_13, %c0_14] : memref<1x384xf32, #tpu.memory_space<vmem>>, vector<1x384xf32>
    %17 = vector.broadcast %16 : vector<1x384xf32> to vector<8x384xf32>
    %18 = arith.addf %15, %17 : vector<8x384xf32>
    %19 = arith.truncf %12 : vector<8x128xf32> to vector<8x128xbf16>
    %c0_15 = arith.constant 0 : index
    %c0_16 = arith.constant 0 : index
    %20 = vector.load %arg7[%c0_15, %c0_16] : memref<128x384xbf16, #tpu.memory_space<vmem>>, vector<128x384xbf16>
    %cst_17 = arith.constant dense<0.000000e+00> : vector<8x384xf32>
    %21 = tpu.matmul %19, %20, %cst_17 {dimension_numbers = #tpu.dot_dimension_numbers<[1], [0], [0], [1], [0, 0, 1, 1], [], []>} : vector<8x128xbf16>, vector<128x384xbf16>, vector<8x384xf32> -> vector<8x384xf32>
    %22 = vector.extract_strided_slice %18 {offsets = [0, 0], sizes = [8, 128], strides = [1, 1]} : vector<8x384xf32> to vector<8x128xf32>
    %23 = vector.extract_strided_slice %21 {offsets = [0, 0], sizes = [8, 128], strides = [1, 1]} : vector<8x384xf32> to vector<8x128xf32>
    %24 = arith.addf %22, %23 : vector<8x128xf32>
    %25 = arith.negf %24 : vector<8x128xf32>
    %26 = math.exp %25 : vector<8x128xf32>
    %cst_18 = arith.constant 1.000000e+00 : f32
    %27 = vector.broadcast %cst_18 : f32 to vector<8x128xf32>
    %28 = arith.addf %27, %26 : vector<8x128xf32>
    %29 = arith.divf %27, %28 : vector<8x128xf32>
    %30 = vector.extract_strided_slice %18 {offsets = [0, 128], sizes = [8, 128], strides = [1, 1]} : vector<8x384xf32> to vector<8x128xf32>
    %31 = vector.extract_strided_slice %21 {offsets = [0, 128], sizes = [8, 128], strides = [1, 1]} : vector<8x384xf32> to vector<8x128xf32>
    %32 = arith.addf %30, %31 : vector<8x128xf32>
    %33 = arith.negf %32 : vector<8x128xf32>
    %34 = math.exp %33 : vector<8x128xf32>
    %cst_19 = arith.constant 1.000000e+00 : f32
    %35 = vector.broadcast %cst_19 : f32 to vector<8x128xf32>
    %36 = arith.addf %35, %34 : vector<8x128xf32>
    %37 = arith.divf %35, %36 : vector<8x128xf32>
    %38 = vector.extract_strided_slice %18 {offsets = [0, 256], sizes = [8, 128], strides = [1, 1]} : vector<8x384xf32> to vector<8x128xf32>
    %39 = vector.extract_strided_slice %21 {offsets = [0, 256], sizes = [8, 128], strides = [1, 1]} : vector<8x384xf32> to vector<8x128xf32>
    %c0_20 = arith.constant 0 : index
    %c0_21 = arith.constant 0 : index
    %40 = vector.load %arg9[%c0_20, %c0_21] : memref<1x128xf32, #tpu.memory_space<vmem>>, vector<1x128xf32>
    %41 = vector.broadcast %40 : vector<1x128xf32> to vector<8x128xf32>
    %42 = arith.addf %39, %41 : vector<8x128xf32>
    %43 = arith.mulf %29, %42 : vector<8x128xf32>
    %44 = arith.addf %38, %43 : vector<8x128xf32>
    %45 = math.tanh %44 : vector<8x128xf32>
    %cst_22 = arith.constant 1.000000e+00 : f32
    %46 = vector.broadcast %cst_22 : f32 to vector<8x128xf32>
    %47 = arith.subf %46, %37 : vector<8x128xf32>
    %48 = arith.mulf %47, %45 : vector<8x128xf32>
    %49 = arith.mulf %37, %12 : vector<8x128xf32>
    %50 = arith.addf %48, %49 : vector<8x128xf32>
    %c0_23 = arith.constant 0 : index
    %c0_24 = arith.constant 0 : index
    %51 = vector.load %arg13[%c0_23, %c0_24] : memref<8x128xf32, #tpu.memory_space<vmem>>, vector<8x128xf32>
    tpu.vector_store %arg13[%c0_23, %c0_24], %50 {strides = array<i32>} : memref<8x128xf32, #tpu.memory_space<vmem>>, vector<8x128xf32>,
    %52 = arith.truncf %50 : vector<8x128xf32> to vector<8x128xbf16>
    %c0_25 = arith.constant 0 : index
    %c0_26 = arith.constant 0 : index
    %53 = vector.load %arg10[%c0_25, %c0_26] : memref<128x128xbf16, #tpu.memory_space<vmem>>, vector<128x128xbf16>
    %cst_27 = arith.constant dense<0.000000e+00> : vector<8x128xf32>
    %54 = tpu.matmul %52, %53, %cst_27 {dimension_numbers = #tpu.dot_dimension_numbers<[1], [0], [0], [1], [0, 0, 1, 1], [], []>} : vector<8x128xbf16>, vector<128x128xbf16>, vector<8x128xf32> -> vector<8x128xf32>
    %c0_28 = arith.constant 0 : index
    %c0_29 = arith.constant 0 : index
    %55 = vector.load %arg11[%c0_28, %c0_29] : memref<1x128xf32, #tpu.memory_space<vmem>>, vector<1x128xf32>
    %56 = vector.broadcast %55 : vector<1x128xf32> to vector<8x128xf32>
    %57 = arith.addf %54, %56 : vector<8x128xf32>
    %58 = tpu.iota {dimensions = array<i32: 1>} : vector<8x128xi32>
    %c6_i32 = arith.constant 6 : i32
    %59 = vector.broadcast %c6_i32 : i32 to vector<8x128xi32>
    %60 = arith.cmpi eq, %58, %59 : vector<8x128xi32>
    %cst_30 = arith.constant 0.000000e+00 : f32
    %61 = vector.broadcast %cst_30 : f32 to vector<8x128xf32>
    %62 = arith.select %60, %57, %61 : vector<8x128xi1>, vector<8x128xf32>
    %cst_31 = arith.constant dense<0.000000e+00> : vector<8xf32>
    %63 = vector.multi_reduction <add>, %62, %cst_31 [1] : vector<8x128xf32> to vector<8xf32>
    %64 = vector.shape_cast %63 : vector<8xf32> to vector<8x1xf32>
    %c6_i32_32 = arith.constant 6 : i32
    %65 = vector.broadcast %c6_i32_32 : i32 to vector<8x128xi32>
    %66 = arith.cmpi slt, %58, %65 : vector<8x128xi32>
    %cst_33 = arith.constant -1.000000e+30 : f32
    %67 = vector.broadcast %cst_33 : f32 to vector<8x128xf32>
    %68 = arith.select %66, %57, %67 : vector<8x128xi1>, vector<8x128xf32>
    %cst_34 = arith.constant dense<0xFF800000> : vector<8xf32>
    %69 = vector.multi_reduction <maximumf>, %68, %cst_34 [1] : vector<8x128xf32> to vector<8xf32>
    %70 = vector.shape_cast %69 : vector<8xf32> to vector<8x1xf32>
    %71 = vector.broadcast %70 : vector<8x1xf32> to vector<8x128xf32>
    %72 = arith.subf %68, %71 : vector<8x128xf32>
    %73 = math.exp %72 : vector<8x128xf32>
    %cst_35 = arith.constant dense<0.000000e+00> : vector<8xf32>
    %74 = vector.multi_reduction <add>, %73, %cst_35 [1] : vector<8x128xf32> to vector<8xf32>
    %75 = vector.shape_cast %74 : vector<8xf32> to vector<8x1xf32>
    %76 = math.log %75 : vector<8x1xf32>
    %77 = arith.addf %70, %76 : vector<8x1xf32>
    %78 = arith.subf %70, %77 : vector<8x1xf32>
    %79 = vector.broadcast %70 : vector<8x1xf32> to vector<8x128xf32>
    %80 = arith.cmpf oge, %68, %79 : vector<8x128xf32>
    %c128_i32 = arith.constant 128 : i32
    %81 = vector.broadcast %c128_i32 : i32 to vector<8x128xi32>
    %82 = arith.select %80, %58, %81 : vector<8x128xi1>, vector<8x128xi32>
    %cst_36 = arith.constant dense<2147483647> : vector<8xi32>
    %83 = vector.multi_reduction <minsi>, %82, %cst_36 [1] : vector<8x128xi32> to vector<8xi32>
    %84 = vector.shape_cast %83 : vector<8xi32> to vector<8x1xi32>
    %85 = arith.sitofp %84 : vector<8x1xi32> to vector<8x1xf32>
    %86 = tpu.iota {dimensions = array<i32: 1>} : vector<8x8xi32>
    %c0_i32 = arith.constant 0 : i32
    %87 = vector.broadcast %c0_i32 : i32 to vector<8x8xi32>
    %88 = arith.cmpi eq, %86, %87 : vector<8x8xi32>
    %c1_i32 = arith.constant 1 : i32
    %89 = vector.broadcast %c1_i32 : i32 to vector<8x8xi32>
    %90 = arith.cmpi eq, %86, %89 : vector<8x8xi32>
    %c2_i32 = arith.constant 2 : i32
    %91 = vector.broadcast %c2_i32 : i32 to vector<8x8xi32>
    %92 = arith.cmpi eq, %86, %91 : vector<8x8xi32>
    %cst_37 = arith.constant 0.000000e+00 : f32
    %93 = vector.shape_cast %85 : vector<8x1xf32> to vector<8x1xf32>
    %94 = vector.broadcast %93 : vector<8x1xf32> to vector<8x8xf32>
    %95 = vector.broadcast %cst_37 : f32 to vector<8x8xf32>
    %96 = arith.select %92, %94, %95 : vector<8x8xi1>, vector<8x8xf32>
    %97 = vector.shape_cast %78 : vector<8x1xf32> to vector<8x1xf32>
    %98 = vector.broadcast %97 : vector<8x1xf32> to vector<8x8xf32>
    %99 = arith.select %90, %98, %96 : vector<8x8xi1>, vector<8x8xf32>
    %100 = vector.shape_cast %64 : vector<8x1xf32> to vector<8x1xf32>
    %101 = vector.broadcast %100 : vector<8x1xf32> to vector<8x8xf32>
    %102 = arith.select %88, %101, %99 : vector<8x8xi1>, vector<8x8xf32>
    %c0_38 = arith.constant 0 : index
    %c0_39 = arith.constant 0 : index
    %103 = vector.load %arg12[%c0_38, %c0_39] : memref<8x8xf32, #tpu.memory_space<vmem>>, vector<8x8xf32>
    tpu.vector_store %arg12[%c0_38, %c0_39], %102 {strides = array<i32>} : memref<8x8xf32, #tpu.memory_space<vmem>>, vector<8x8xf32>,
    return
  }
  func.func @transform_0(%arg0: i32) -> (i32, i32) {
    %c0_i32 = arith.constant 0 : i32
    %c0_i32_0 = arith.constant 0 : i32
    return %arg0, %c0_i32 : i32, i32
  }
  func.func @transform_1(%arg0: i32) -> (i32, i32) {
    %c0_i32 = arith.constant 0 : i32
    %c0_i32_0 = arith.constant 0 : i32
    return %arg0, %c0_i32 : i32, i32
  }
  func.func @transform_2(%arg0: i32) -> (i32, i32) {
    %c0_i32 = arith.constant 0 : i32
    %c0_i32_0 = arith.constant 0 : i32
    return %arg0, %c0_i32 : i32, i32
  }
  func.func @transform_3(%arg0: i32) -> (i32, i32) {
    %c0_i32 = arith.constant 0 : i32
    %c0_i32_0 = arith.constant 0 : i32
    %c0_i32_1 = arith.constant 0 : i32
    return %c0_i32, %c0_i32_0 : i32, i32
  }
  func.func @transform_4(%arg0: i32) -> (i32, i32) {
    %c0_i32 = arith.constant 0 : i32
    %c0_i32_0 = arith.constant 0 : i32
    %c0_i32_1 = arith.constant 0 : i32
    return %c0_i32, %c0_i32_0 : i32, i32
  }
  func.func @transform_5(%arg0: i32) -> (i32, i32) {
    %c0_i32 = arith.constant 0 : i32
    %c0_i32_0 = arith.constant 0 : i32
    %c0_i32_1 = arith.constant 0 : i32
    return %c0_i32, %c0_i32_0 : i32, i32
  }
  func.func @transform_6(%arg0: i32) -> (i32, i32) {
    %c0_i32 = arith.constant 0 : i32
    %c0_i32_0 = arith.constant 0 : i32
    %c0_i32_1 = arith.constant 0 : i32
    return %c0_i32, %c0_i32_0 : i32, i32
  }
  func.func @transform_7(%arg0: i32) -> (i32, i32) {
    %c0_i32 = arith.constant 0 : i32
    %c0_i32_0 = arith.constant 0 : i32
    %c0_i32_1 = arith.constant 0 : i32
    return %c0_i32, %c0_i32_0 : i32, i32
  }
  func.func @transform_8(%arg0: i32) -> (i32, i32) {
    %c0_i32 = arith.constant 0 : i32
    %c0_i32_0 = arith.constant 0 : i32
    %c0_i32_1 = arith.constant 0 : i32
    return %c0_i32, %c0_i32_0 : i32, i32
  }
  func.func @transform_9(%arg0: i32) -> (i32, i32) {
    %c0_i32 = arith.constant 0 : i32
    %c0_i32_0 = arith.constant 0 : i32
    %c0_i32_1 = arith.constant 0 : i32
    return %c0_i32, %c0_i32_0 : i32, i32
  }
  func.func @transform_10(%arg0: i32) -> (i32, i32) {
    %c0_i32 = arith.constant 0 : i32
    %c0_i32_0 = arith.constant 0 : i32
    %c0_i32_1 = arith.constant 0 : i32
    return %c0_i32, %c0_i32_0 : i32, i32
  }
  func.func @transform_11(%arg0: i32) -> (i32, i32) {
    %c0_i32 = arith.constant 0 : i32
    %c0_i32_0 = arith.constant 0 : i32
    return %arg0, %c0_i32 : i32, i32
  }
  func.func @transform_12(%arg0: i32) -> (i32, i32) {
    %c0_i32 = arith.constant 0 : i32
    %c0_i32_0 = arith.constant 0 : i32
    return %arg0, %c0_i32 : i32, i32
  }
}

</mosaic_0001>

<bundles_post_ra>
// kernel: policy_act.1
= control target key start
LH: loop header
LB: loop body
LE: loop exit
PB: predicated region body
PF: predicated region fallthrough
CT: control target
= control target key end

     0   :  { %s2693_s0 = inlined_call_operand.vmem [shape: f32[22,40], index: 0, kind: input, shape index: {}]   ;;  %s2694_s1 = inlined_call_operand.hbm [shape: f32[22,128], index: 1, kind: input, shape index: {}]   ;;  %s2695_s2 = inlined_call_operand.vmem [shape: f32[22,1], index: 2, kind: input, shape index: {}]   ;;  %s2696_s3 = inlined_call_operand.vmem [shape: bf16[40,128], index: 3, kind: input, shape index: {}]   ;;  %s2697_s4 = inlined_call_operand.hbm [shape: f32[1,128], index: 4, kind: input, shape index: {}]   ;;  %s2698_s5 = inlined_call_operand.hbm [shape: bf16[128,384], index: 5, kind: input, shape index: {}]   ;;  %s2699_s6 = inlined_call_operand.hbm [shape: bf16[128,384], index: 6, kind: input, shape index: {}]   ;;  %s2700_s7 = inlined_call_operand.vmem [shape: f32[1,384], index: 7, kind: input, shape index: {}]   ;;  %s2701_s8 = inlined_call_operand.hbm [shape: f32[1,128], index: 8, kind: input, shape index: {}]   ;;  %s2702_s9 = inlined_call_operand.hbm [shape: bf16[128,128], index: 9, kind: input, shape index: {}]   ;;  %s2703_s10 = inlined_call_operand.hbm [shape: f32[1,128], index: 10, kind: input, shape index: {}]   ;;  %s2704_s11 = inlined_call_operand.vmem [shape: f32[22,8], index: 11, kind: output, shape index: {0}]   ;;  %s2705_s12 = inlined_call_operand.hbm [shape: f32[22,128], index: 12, kind: output, shape index: {1}]  }
   0x1   :  { %2712 = sst [smem:[#allocation20_spill]] %s2693_s0 }
   0x2   :  { %2713 = sst [smem:[#allocation21_spill]] %s2697_s4 }
   0x3   :  { %2714 = sst [smem:[#allocation22_spill]] %s2699_s6 }
   0x4   :  { %2715 = sst [smem:[#allocation23_spill]] %s2700_s7 }
   0x5   :  { %2716 = sst [smem:[#allocation24_spill]] %s2704_s11 }
   0x6   :  { %2717 = sst [smem:[#allocation25_spill]] %s2705_s12 }
   0x7   :  { %18 = vsyncpa [#allocation3], 0 }
   0x8   :  { %20 = vsyncpa [#allocation3 + $0x1], 0 }
   0x9   :  { %21 = vsyncpa [#allocation6], 0 }
   0xa   :  { %22 = vsyncpa [#allocation9], 0 }
   0xb   :  { %23 = vsyncpa [#allocation12], 0 }
   0xc   :  { %24 = vsyncpa [#allocation4], 0 }
   0xd   :  { %26 = vsyncpa [#allocation4 + $0x1], 0  ;;  %s2286_s21 = smov 0   ;;  %s2288_s22 = smov 0  }
   0xe   :  { %s2290_s23 = smov 0   ;;  %s2292_s24 = smov 0  }
   0xf LB: > { %s2206_s25 = smov [#allocation5]   ;;  %s2307_s27 = sadd.s32 4294967295, %s2204_s24   ;;  %s2204_s24 = sphi %s2292_s24, %s2747_s24   ;;  %s2200_s23 = sphi %s2290_s23, %s2746_s23   ;;  %s2196_s22 = sphi %s2288_s22, %s2745_s22   ;;  %s2192_s21 = sphi %s2286_s21, %s2744_s21  }
  0x10   : > { %s351_s26 = sshll.u32 %s2206_s25, 4  ;;  %p1526_p0 = scmp.ge.s32.totalorder %s2204_s24, 1  ;;  %s352_s26 = int_to_ptr.vmem [resolvable:$true] %s351_s26 }
  0x11   : > { %p2706_p1 = scmp.eq.s32.totalorder %s2307_s27, 0  ;;  %p335_p2 = scmp.lt.s32.totalorder %s2204_s24, 4 }
  0x12   : > { %s2207_s29 = smov [#allocation8]   ;;  %s2208_s14 = smov [#allocation11]  }
  0x13   : > { %p2312_p3 = pnand %p1526_p0, %p335_p2  ;;  %s374_s30 = sshll.u32 %s2207_s29, 4  ;;  %s2324_s30 = int_to_ptr.vmem [resolvable:$true] %s374_s30 }
  0x14   : > { %s401_s15 = sshll.u32 %s2208_s14, 4  ;;  %s2720_s4 = sld [smem:[#allocation21_spill]]  ;;  %s2326_s15 = int_to_ptr.vmem [resolvable:$true] %s401_s15 }
  0x15   : > { %s2718_s28 = scalar_select %p2312_p3, 1, 0 }
  0x16   : > { %p1752_p4 = pneg %p2312_p3 }
  0x18   : > { %p2320_p5 = pnand %p1752_p4, %p2706_p1 }
  0x1a   : > { %s1928_s18 = scalar_lea.hbm %s2720_s4, 16  ;;  %p2336_p7 = pneg %p2320_p5 }
  0x1b   : > { %p1929_p6 = scmp.ne.s32.totalorder %s2720_s4, %s1928_s18  ;;  %p1935_p10 = scmp.lt.u32.totalorder %s1928_s18, %s2720_s4 }
  0x1d   : > { %p1931_p8 = pnand %p2336_p7, %p1929_p6 }
  0x1f   : > { %p1932_p9 = pneg %p1931_p8 }
  0x21   : > { %p1937_p11 = pnand %p1935_p10, %p1932_p9 }
  0x23   : > { %1940 = shalt.err (!%p1937_p11)
}
  0x24   : > { %s1941_s16 = scalar_lea.vmem %s352_s26, 16  ;;  %s1948_s17 = scalar_lea.vmem %s352_s26, 32 }
  0x25   : > { %p1942_p12 = scmp.ne.s32.totalorder %s352_s26, %s1941_s16  ;;  %p1949_p2 = scmp.lt.s32.totalorder %s352_s26, %s352_s26 }
  0x26   : > { %p1950_p4 = scmp.lt.s32.totalorder %s1948_s17, %s1941_s16 }
  0x27   : > { %p1944_p13 = pnand %p1942_p12, %p2336_p7 }
  0x28   : > { %p1951_p1 = por %p1950_p4, %p1949_p2 }
  0x29   : > { %p1945_p0 = pneg %p1944_p13 }
  0x2b   : > { %p1952_p3 = pnand %p1951_p1, %p1945_p0 }
  0x2d   : > { %1955 = shalt.err (!%p1952_p3)
}
  0x2e   : > { %1755 = dma.hbm_to_vmem [thread:$0]  (!%p2320_p5), %s2720_s4, 16, %s352_s26, [#allocation6]  }
  0x2f   : > { %s2722_s6 = sld [smem:[#allocation22_spill]] }
  0x35   : > { %s1956_s14 = scalar_lea.hbm %s2722_s6, 3072 }
  0x36   : > { %p1957_p6 = scmp.ne.s32.totalorder %s2722_s6, %s1956_s14  ;;  %p1963_p1 = scmp.lt.u32.totalorder %s1956_s14, %s2722_s6 }
  0x38   : > { %p1959_p8 = pnand %p1957_p6, %p2336_p7 }
  0x3a   : > { %p1960_p9 = pneg %p1959_p8 }
  0x3c   : > { %p1965_p3 = pnand %p1963_p1, %p1960_p9 }
  0x3e   : > { %1968 = shalt.err (!%p1965_p3)
}
  0x3f   : > { %s1969_s26 = scalar_lea.vmem %s2324_s30, 3072  ;;  %p1977_p13 = scmp.lt.s32.totalorder %s2324_s30, %s2324_s30 }
  0x40   : > { %p1970_p10 = scmp.ne.s32.totalorder %s2324_s30, %s1969_s26  ;;  %p1978_p0 = scmp.lt.s32.totalorder %s1969_s26, %s1969_s26 }
  0x42   : > { %p1972_p11 = pnand %p1970_p10, %p2336_p7  ;;  %p1979_p2 = por %p1978_p0, %p1977_p13 }
  0x44   : > { %p1973_p12 = pneg %p1972_p11 }
  0x46   : > { %p1980_p4 = pnand %p1979_p2, %p1973_p12 }
  0x48   : > { %1983 = shalt.err (!%p1980_p4)
}
  0x49   : > { %s2709_s11 = smov 192   ;;  %s2710_s12 = smov 12  }
  0x4a   : > { %1761 = dma.hbm_to_vmem [thread:$0]  (!%p2320_p5), %s2722_s6, 3072, %s2324_s30, [#allocation9], %s2709_s11, %s2709_s11, %s2710_s12  }
  0x4b   : > { %s1984_s14 = scalar_lea.hbm %s2702_s9, 1024 }
  0x4c   : > { %p1985_p6 = scmp.ne.s32.totalorder %s2702_s9, %s1984_s14  ;;  %p1991_p1 = scmp.lt.u32.totalorder %s1984_s14, %s2702_s9 }
  0x4e   : > { %p1987_p8 = pnand %p1985_p6, %p2336_p7 }
  0x50   : > { %p1988_p9 = pneg %p1987_p8 }
  0x52   : > { %p1993_p3 = pnand %p1991_p1, %p1988_p9 }
  0x54   : > { %1996 = shalt.err (!%p1993_p3)
}
  0x55   : > { %s1997_s30 = scalar_lea.vmem %s2326_s15, 1024  ;;  %p2005_p13 = scmp.lt.s32.totalorder %s2326_s15, %s2326_s15 }
  0x56   : > { %p1998_p10 = scmp.ne.s32.totalorder %s2326_s15, %s1997_s30  ;;  %p2006_p0 = scmp.lt.s32.totalorder %s1997_s30, %s1997_s30 }
  0x58   : > { %p2000_p11 = pnand %p1998_p10, %p2336_p7  ;;  %p2007_p2 = por %p2006_p0, %p2005_p13 }
  0x5a   : > { %p2001_p12 = pneg %p2000_p11 }
  0x5c   : > { %p2008_p4 = pnand %p2007_p2, %p2001_p12 }
  0x5e   : > { %2011 = shalt.err (!%p2008_p4)
}
  0x5f   : > { %s2211_s19 = smov 64   ;;  %s2212_s4 = smov 4  }
  0x60   : > { %1767 = dma.hbm_to_vmem [thread:$0]  (!%p2320_p5), %s2702_s9, 1024, %s2326_s15, [#allocation12], %s2211_s19, %s2211_s19, %s2212_s4  }
  0x61   : > { %s2213_s29 = smov [#allocation7]   ;;  %s2214_s16 = smov [#allocation10]  }
  0x62   : > { %s361_s14 = sshll.u32 %s2213_s29, 4  ;;  %s391_s17 = sshll.u32 %s2214_s16, 4  ;;  %s362_s14 = int_to_ptr.vmem [resolvable:$true] %s361_s14  ;;  %s392_s17 = int_to_ptr.vmem [resolvable:$true] %s391_s17 }
  0x63   : > { %s2012_s11 = scalar_lea.hbm %s2698_s5, 3072 }
  0x64   : > { %p2013_p6 = scmp.ne.s32.totalorder %s2698_s5, %s2012_s11  ;;  %p2019_p1 = scmp.lt.u32.totalorder %s2012_s11, %s2698_s5 }
  0x66   : > { %p2015_p8 = pnand %p2013_p6, %p2336_p7 }
  0x68   : > { %p2016_p9 = pneg %p2015_p8 }
  0x6a   : > { %p2021_p3 = pnand %p2019_p1, %p2016_p9 }
  0x6c   : > { %2024 = shalt.err (!%p2021_p3)
}
  0x6d   : > { %s2025_s15 = scalar_lea.vmem %s362_s14, 3072  ;;  %p2033_p13 = scmp.lt.s32.totalorder %s362_s14, %s362_s14 }
  0x6e   : > { %p2026_p10 = scmp.ne.s32.totalorder %s362_s14, %s2025_s15  ;;  %p2034_p0 = scmp.lt.s32.totalorder %s2025_s15, %s2025_s15 }
  0x70   : > { %p2028_p11 = pnand %p2026_p10, %p2336_p7  ;;  %p2035_p2 = por %p2034_p0, %p2033_p13 }
  0x72   : > { %p2029_p12 = pneg %p2028_p11 }
  0x74   : > { %p2036_p4 = pnand %p2035_p2, %p2029_p12 }
  0x76   : > { %2039 = shalt.err (!%p2036_p4)
}
  0x77   : > { %s2723_s6 = smov 12   ;;  %s2724_s12 = smov 192  }
  0x78   : > { %1758 = dma.hbm_to_vmem [thread:$0]  (!%p2320_p5), %s2698_s5, 3072, %s362_s14, [#allocation6], %s2724_s12, %s2724_s12, %s2723_s6  }
  0x79   : > { %s2040_s4 = scalar_lea.hbm %s2701_s8, 16 }
  0x7a   : > { %p2041_p6 = scmp.ne.s32.totalorder %s2701_s8, %s2040_s4  ;;  %p2047_p1 = scmp.lt.u32.totalorder %s2040_s4, %s2701_s8 }
  0x7c   : > { %p2043_p8 = pnand %p2041_p6, %p2336_p7 }
  0x7e   : > { %p2044_p9 = pneg %p2043_p8 }
  0x80   : > { %p2049_p3 = pnand %p2047_p1, %p2044_p9 }
  0x82   : > { %2052 = shalt.err (!%p2049_p3)
}
  0x83   : > { %s2053_s26 = scalar_lea.vmem %s392_s17, 16  ;;  %s2060_s14 = scalar_lea.vmem %s392_s17, 32 }
  0x84   : > { %p2054_p10 = scmp.ne.s32.totalorder %s392_s17, %s2053_s26  ;;  %p2061_p13 = scmp.lt.s32.totalorder %s392_s17, %s392_s17 }
  0x85   : > { %p2062_p0 = scmp.lt.s32.totalorder %s2060_s14, %s2053_s26 }
  0x86   : > { %p2056_p11 = pnand %p2054_p10, %p2336_p7 }
  0x87   : > { %p2063_p2 = por %p2062_p0, %p2061_p13 }
  0x88   : > { %p2057_p12 = pneg %p2056_p11 }
  0x8a   : > { %p2064_p4 = pnand %p2063_p2, %p2057_p12 }
  0x8c   : > { %2067 = shalt.err (!%p2064_p4)
}
  0x8d   : > { %1764 = dma.hbm_to_vmem [thread:$0]  (!%p2320_p5), %s2701_s8, 16, %s392_s17, [#allocation9]  }
  0x8e   : > { %s2215_s6 = smov [#allocation13]   ;;  %s2068_s11 = scalar_lea.hbm %s2703_s10, 16 }
  0x8f   : > { %s415_s12 = sshll.u32 %s2215_s6, 4  ;;  %p2069_p6 = scmp.ne.s32.totalorder %s2703_s10, %s2068_s11  ;;  %s416_s12 = int_to_ptr.vmem [resolvable:$true] %s415_s12 }
  0x90   : > { %p2075_p1 = scmp.lt.u32.totalorder %s2068_s11, %s2703_s10 }
  0x91   : > { %p2071_p8 = pnand %p2069_p6, %p2336_p7 }
  0x93   : > { %p2072_p9 = pneg %p2071_p8 }
  0x95   : > { %p2077_p3 = pnand %p2075_p1, %p2072_p9 }
  0x97   : > { %2080 = shalt.err (!%p2077_p3)
}
  0x98   : > { %s2081_s17 = scalar_lea.vmem %s416_s12, 16  ;;  %s2088_s29 = scalar_lea.vmem %s416_s12, 32 }
  0x99   : > { %p2082_p10 = scmp.ne.s32.totalorder %s416_s12, %s2081_s17  ;;  %p2089_p13 = scmp.lt.s32.totalorder %s416_s12, %s416_s12 }
  0x9a   : > { %p2090_p0 = scmp.lt.s32.totalorder %s2088_s29, %s2081_s17 }
  0x9b   : > { %p2084_p11 = pnand %p2082_p10, %p2336_p7 }
  0x9c   : > { %p2091_p2 = por %p2090_p0, %p2089_p13 }
  0x9d   : > { %p2085_p12 = pneg %p2084_p11 }
  0x9f   : > { %p2092_p4 = pnand %p2091_p2, %p2085_p12 }
  0xa1   : > { %2095 = shalt.err (!%p2092_p4)
}
  0xa2   : > { %1770 = dma.hbm_to_vmem [thread:$0]  (!%p2320_p5), %s2703_s10, 16, %s416_s12, [#allocation12]  }
  0xa3   : > { %s1525_s25 = sadd.s32 4294967294, %s2204_s24   ;;  %s2460_s13 = sadd.s32 1, %s2204_s24  }
  0xa4   : > { %s62_s14 = ssub.s32 %s2204_s24, %s2460_s13  ;;  %s65_s30 = sadd.s32 1, %s2200_s23 }
  0xa5   : > { %p63_p7 = scmp.eq.s32.totalorder %s62_s14, 0  ;;  %p72_p6 = scmp.ne.s32.totalorder %s2200_s23, %s2196_s22 }
  0xa6   : > { %p73_p8 = scmp.eq.s32.totalorder %s2204_s24, 0  ;;  %p78_p9 = scmp.ne.s32.totalorder %s2196_s22, %s2192_s21 }
  0xa7   : > { %s2471_s15 = scalar_select %p63_p7, %s2200_s23, %s65_s30  }
  0xa8   : > { %p2473_p1 = por %p73_p8, %p72_p6  ;;  %p2726_p3 = scmp.eq.s32.totalorder %s2307_s27, 0 }
  0xa9   : > { %p322_p10 = scmp.eq.s32.totalorder %s2307_s27, 2  ;;  %p328_p11 = scmp.eq.s32.totalorder %s1525_s25, 2 }
  0xaa   : > { %p2479_p5 = por %p2726_p3, %p78_p9  ;;  %p1785_p12 = scmp.lt.s32.totalorder %s2204_s24, 3 }
  0xab   : > { %s433_s0 = sand.u32 1, %s2200_s23   ;;  %p2486_p13 = por %p322_p10, %p72_p6 }
  0xac   : > { %p2490_p0 = por %p328_p11, %p78_p9  ;;  %s1534_s19 = sshll.u32 %s433_s0, 3 }
  0xad   : > { %s2728_s7 = scalar_select %p2486_p13, 1, 0 }
  0xae   : > { %s2729_s11 = scalar_select %p2490_p0, 1, 0 }
  0xaf   : > { %s1535_s4 = sshll.u32 %s2204_s24, 7  ;;  %s437_s29 = scalar_lea.vmem [#allocation2], %s1534_s19 }
  0xb0   : > { %s2498_s17 = scalar_lea.hbm %s2694_s1, %s1535_s4  ;;  %s444_s16 = sshll.u32 %s437_s29, 4  ;;  %s2500_s16 = int_to_ptr.vmem [resolvable:$true] %s444_s16 }
  0xb1   : > { %p2504_p2 = pnand %p1785_p12, %p2473_p1  ;;  %s434_s25 = scalar_lea.sflag [#allocation3], %s433_s0 }
  0xb2   : > { %s2096_s14 = scalar_lea.hbm %s2498_s17, 128  ;;  %s2101_s4 = scalar_lea.hbm %s2694_s1, 384 }
  0xb3   : > { %p2097_p4 = scmp.ne.s32.totalorder %s2498_s17, %s2096_s14  ;;  %p2098_p7 = pneg %p2504_p2 }
  0xb4   : > { %p2102_p9 = scmp.lt.u32.totalorder %s2498_s17, %s2694_s1  ;;  %p2103_p1 = scmp.lt.u32.totalorder %s2101_s4, %s2096_s14 }
  0xb5   : > { %p2099_p6 = pnand %p2098_p7, %p2097_p4  ;;  %p2105_p10 = scmp.lt.u32.totalorder %s2096_s14, %s2498_s17 }
  0xb6   : > { %p2104_p3 = por %p2103_p1, %p2102_p9 }
  0xb7   : > { %p2100_p8 = pneg %p2099_p6 }
  0xb8   : > { %p2106_p11 = por %p2105_p10, %p2104_p3 }
  0xba   : > { %p2107_p12 = pnand %p2106_p11, %p2100_p8 }
  0xbc   : > { %2110 = shalt.err (!%p2107_p12)
}
  0xbd   : > { %s2111_s0 = scalar_lea.vmem %s2500_s16, 128  ;;  %s2216_s18 = smov [#allocation2]  }
  0xbe   : > { %p2112_p4 = scmp.ne.s32.totalorder %s2500_s16, %s2111_s0  ;;  %s2116_s29 = sshll.u32 %s2216_s18, 4  ;;  %s2117_s29 = int_to_ptr.vmem [resolvable:$false] %s2116_s29 }
  0xbf   : > { %s2118_s30 = scalar_lea.vmem %s2117_s29, 256  ;;  %p2119_p13 = scmp.lt.s32.totalorder %s2500_s16, %s2117_s29 }
  0xc0   : > { %p2114_p6 = pnand %p2112_p4, %p2098_p7  ;;  %p2120_p9 = scmp.lt.s32.totalorder %s2118_s30, %s2111_s0 }
  0xc2   : > { %p2115_p0 = pneg %p2114_p6  ;;  %p2121_p1 = por %p2120_p9, %p2119_p13 }
  0xc4   : > { %p2122_p3 = pnand %p2121_p1, %p2115_p0 }
  0xc6   : > { %2125 = shalt.err (!%p2122_p3)
}
  0xc7   : > { %1774 = dma.hbm_to_vmem [thread:$0]  (!%p2504_p2), %s2498_s17, 128, %s2500_s16, %s434_s25  }
  0xc8   : > { %p2731_p8 = scmp.ne.s32.totalorder %s2718_s28, 0 }
  0xc9   : > { %s2536_s14 = sand.u32 (!%p2731_p8), 1, %s2196_s22  }
  0xca   : > { %460 = sbr.rel (%p2731_p8) target bundleno = 1404 (0x57c), region = 64  ;;  %s1537_s19 = sshll.u32 (!%p2731_p8), %s2536_s14, 3 }
  0xcb   : > { %s463_s4 = scalar_lea.sflag (!%p2731_p8), [#allocation3], %s2536_s14  ;;  %s2542_s6 = scalar_lea.vmem (!%p2731_p8), [#allocation2], %s1537_s19 }
  0xd1   : > { %2171 = dma.done.wait (%p2479_p5), %s463_s4, 128  }
  0xd2   : > { %2173 = vsyncadd (%p2479_p5), %s463_s4, 4294967168  ;;  %p2732_p13 = scmp.eq.s32.totalorder %s2307_s27, 0 }
  0xd4   : > { %2175 = dma.done.wait (%p2732_p13), [#allocation6], 3088   ;;  %p2733_p0 = pmov %p2732_p13 }
  0xd6   : > { %2177 = vsyncadd (%p2733_p0), [#allocation6], 4294964208  ;;  %p2734_p2 = pmov %p2733_p0 }
  0xd7   : > { %p2735_p7 = pmov %p2733_p0 }
  0xd8   : > { %2179 = dma.done.wait (%p2734_p2), [#allocation9], 3088  }
  0xd9   : > { %2181 = vsyncadd (%p2735_p7), [#allocation9], 4294964208  ;;  %p2736_p10 = pmov %p2733_p0 }
  0xda   : > { %p2737_p11 = pmov %p2733_p0 }
  0xdb   : > { %2183 = dma.done.wait (%p2736_p10), [#allocation12], 1040  }
  0xdc   : > { %2185 = vsyncadd (%p2737_p11), [#allocation12], 4294966256  ;;  %p543_p5 = scmp.lt.s32.totalorder %s2307_s27, 2  ;;  %v2217_v0 = vmov 0.0   ;;  %vm2218_vm0 = vmmov 0   ;;  %v2219_v1 = vmov 0  }
  0xdd   : > { %1648 = vmatprep.subr.bf16.mxu0 %v2217_v0  ;;  %1654 = vmatprep.mubr.msk.bf16.mxu0 %vm2218_vm0, %v2217_v0  ;;  %v1839_v2 = vld [vmem:[%s2696_s3] sm:$0xff]   ;;  %v1840_v3 = vld [vmem:[%s2696_s3 + $0x8] sm:$0xff]   ;;  %v1841_v4 = vld [vmem:[%s2696_s3 + $0x10] ss:$0 sps:$4 sm:$0xff]   ;;  %vm589_vm1 = vcmask 1043456   ;;  %s2738_s17 = sld [smem:[#allocation20_spill]] }
  0xde   : > { %s544_s28 = scalar_select %p543_p5, %s2307_s27, 2  ;;  %1838 = vset.pattern.permute.xlu0 %v2219_v1  ;;  %852 = vmatprep.mubr.bf16.mxu1 %v2219_v1  ;;  %v1842_v6 = vld [vmem:[#allocation7 + $0x4] ss:$12 sps:$4 sm:$0xff]   ;;  %v1844_v7 = vld [vmem:[#allocation7] ss:$12 sps:$4 sm:$0xff]   ;;  %v591_v8 = vsel %vm589_vm1, %v1841_v4, 0 }
  0xdf   : > { %1649 = vmatpush3.bf16.msra.mxu0 %v1839_v2  ;;  %820 = vmatprep.subr.bf16.mxu1 %v1842_v6  ;;  %v1846_v10 = vld [vmem:[#allocation7 + $0x1c] ss:$12 sps:$4 sm:$0xff]   ;;  %v1848_v11 = vld [vmem:[#allocation7 + $0x18] ss:$12 sps:$4 sm:$0xff]   ;;  %v1850_v12 = vld [vmem:[#allocation7 + $0x34] ss:$12 sps:$4 sm:$0xff]  }
  0xe0   : > { %s2567_s12 = sshll.u32 %s544_s28, 3  ;;  %1650 = vmatprep.subr.bf16.mxu0 %v2217_v0  ;;  %821 = vmatpush1.bf16.msra.mxu1 %v1844_v7  ;;  %vm585_vm2 = vcmask 326656   ;;  %v1845_v14 = vld [vmem:[#allocation7 + $0x8] ss:$12 sps:$4 sm:$0xff]   ;;  %v1852_v15 = vld [vmem:[#allocation7 + $0x30] ss:$12 sps:$4 sm:$0xff]  }
  0xe1   : > { %s550_s20 = scalar_lea.vmem %s2695_s2, %s2567_s12  ;;  %822 = vmatprep.subr.bf16.mxu1 %v1846_v10  ;;  %v1854_v16 = vld [vmem:[#allocation7 + $0x4c] ss:$12 sps:$4 sm:$0xff]   ;;  %v1856_v18 = vld [vmem:[#allocation7 + $0x48] ss:$12 sps:$4 sm:$0xff]   ;;  %v1858_v19 = vld [vmem:[#allocation7 + $0x64] ss:$12 sps:$4 sm:$0xff]  }
  0xe2   : > { %v635_v5 = vld [vmem:[%s550_s20] sm:$0xff]  ;;  %v1853_v20 = vld [vmem:[#allocation7 + $0x38] ss:$12 sps:$4 sm:$0xff]   ;;  %v1862_v22 = vld [vmem:[#allocation7 + $0x7c] ss:$12 sps:$4 sm:$0xff]   ;;  %s2739_s25 = sld [smem:[#allocation23_spill]] }
  0xe3   : > { %s546_s16 = scalar_lea.vmem %s2738_s17, %s2567_s12  ;;  %638 = vperm.xlu0 %1838, %v635_v5   ;;  %1651 = vmatpush3.bf16.msra.mxu0 %v1840_v3  ;;  %v1849_v17 = vld [vmem:[#allocation7 + $0x20] ss:$12 sps:$4 sm:$0xff]   ;;  %v1857_v23 = vld [vmem:[#allocation7 + $0x50] ss:$12 sps:$4 sm:$0xff]   ;;  %v1864_v24 = vld [vmem:[#allocation7 + $0x78] ss:$12 sps:$4 sm:$0xff]  }
  0xe4   : > { %v556_v9 = vld [vmem:[%s546_s16] sm:$0xff]  ;;  %1652 = vmatprep.subr.bf16.mxu0 %v2217_v0  ;;  %823 = vmatpush1.bf16.msra.mxu1 %v1848_v11  ;;  %v1869_v29 = vld [vmem:[#allocation7 + $0x98] ss:$12 sps:$4 sm:$0xff]   ;;  %v1548_v34 = vld [vmem:[#allocation5] ss:$0 sm:$0xff]  ;;  %s2630_s20 = scalar_lea.vmem [#allocation14], %s1537_s19 }
  0xe5   : > { %v557_v13 = vpack.c.bf16 %v556_v9, %v556_v9  ;;  %824 = vmatprep.subr.bf16.mxu1 %v1850_v12  ;;  %v1860_v21 = vld [vmem:[#allocation7 + $0x60] ss:$12 sps:$4 sm:$0xff]   ;;  %v1861_v26 = vld [vmem:[#allocation7 + $0x68] ss:$12 sps:$4 sm:$0xff]   ;;  %v1868_v27 = vld [vmem:[#allocation7 + $0x90] ss:$12 sps:$4 sm:$0xff]  }
  0xe6   : > { %v1866_v25 = vld [vmem:[#allocation7 + $0x94] ss:$12 sps:$4 sm:$0xff]   ;;  %v1870_v30 = vld [vmem:[#allocation7 + $0xac] ss:$12 sps:$4 sm:$0xff]   ;;  %v1873_v32 = vld [vmem:[#allocation7 + $0xb0] ss:$12 sps:$4 sm:$0xff]  }
  0xe7   : > { %1653 = vmatpush3.bf16.msra.mxu0 %v591_v8  ;;  %v1865_v28 = vld [vmem:[#allocation7 + $0x80] ss:$12 sps:$4 sm:$0xff]   ;;  %v1872_v31 = vld [vmem:[#allocation7 + $0xa8] ss:$12 sps:$4 sm:$0xff]   ;;  %v1876_v33 = vld [vmem:[#allocation8 + $0x4] ss:$12 sps:$4 sm:$0xff]  }
  0xe8   : > { %1658 = vmatprep.subr.bf16.mxu0 %v2217_v0  ;;  %825 = vmatpush1.bf16.msra.mxu1 %v1852_v15  ;;  %v1874_v41 = vld [vmem:[#allocation8] ss:$12 sps:$4 sm:$0xff]   ;;  %v1877_v42 = vld [vmem:[#allocation8 + $0x8] ss:$12 sps:$4 sm:$0xff]   ;;  %v1878_v45 = vld [vmem:[#allocation8 + $0x18] ss:$12 sps:$4 sm:$0xff]  }
  0xe9   : > { %826 = vmatprep.subr.bf16.mxu1 %v1854_v16  ;;  %v1880_v44 = vld [vmem:[#allocation8 + $0x1c] ss:$12 sps:$4 sm:$0xff]   ;;  %v1881_v46 = vld [vmem:[#allocation8 + $0x20] ss:$12 sps:$4 sm:$0xff]   ;;  %v1885_v49 = vld [vmem:[#allocation8 + $0x38] ss:$12 sps:$4 sm:$0xff]  }
  0xea   : > { %1655 = vmatmul.mubr.msk.bf16.vlgmr.msra.gmra.mrb[0].mxu0 %vm585_vm2, %v557_v13  ;;  %v1884_v47 = vld [vmem:[#allocation8 + $0x34] ss:$12 sps:$4 sm:$0xff]   ;;  %v1882_v48 = vld [vmem:[#allocation8 + $0x30] ss:$12 sps:$4 sm:$0xff]   ;;  %v1888_v50 = vld [vmem:[#allocation8 + $0x4c] ss:$12 sps:$4 sm:$0xff]  }
  0xeb   : > { %1659 = vmatpush3.bf16.msra.mxu0 %v1845_v14  ;;  %1674 = vmatprep.mubr.msk.bf16.mxu0 %vm2218_vm0, %v2217_v0  ;;  %v1886_v51 = vld [vmem:[#allocation8 + $0x48] ss:$12 sps:$4 sm:$0xff]   ;;  %v1889_v52 = vld [vmem:[#allocation8 + $0x50] ss:$12 sps:$4 sm:$0xff]   ;;  %v1890_v54 = vld [vmem:[#allocation8 + $0x60] ss:$12 sps:$4 sm:$0xff]  }
  0xec   : > { %1660 = vmatprep.subr.bf16.mxu0 %v2217_v0  ;;  %827 = vmatpush1.bf16.msra.mxu1 %v1856_v18  ;;  %v1892_v53 = vld [vmem:[#allocation8 + $0x64] ss:$12 sps:$4 sm:$0xff]   ;;  %v1893_v55 = vld [vmem:[#allocation8 + $0x68] ss:$12 sps:$4 sm:$0xff]   ;;  %v1897_v58 = vld [vmem:[#allocation8 + $0x80] ss:$12 sps:$4 sm:$0xff]   ;;  %v677_v18 = vlaneseq }
  0xed   : > { %828 = vmatprep.subr.bf16.mxu1 %v1858_v19  ;;  %v1896_v56 = vld [vmem:[#allocation8 + $0x7c] ss:$12 sps:$4 sm:$0xff]   ;;  %v1894_v57 = vld [vmem:[#allocation8 + $0x78] ss:$12 sps:$4 sm:$0xff]   ;;  %v1900_v59 = vld [vmem:[#allocation8 + $0x94] ss:$12 sps:$4 sm:$0xff]  }
  0xee   : > { %v1898_v60 = vld [vmem:[#allocation8 + $0x90] ss:$12 sps:$4 sm:$0xff]   ;;  %v1901_v61 = vld [vmem:[#allocation8 + $0x98] ss:$12 sps:$4 sm:$0xff]   ;;  %v1902_v3 = vld [vmem:[#allocation8 + $0xa8] ss:$12 sps:$4 sm:$0xff]  }
  0xef   : > { %1661 = vmatpush3.bf16.msra.mxu0 %v1849_v17  ;;  %v634_v63 = vld [vmem:[%s2542_s6] sm:$0xff]  ;;  %v1906_v6 = vld [vmem:[#allocation11] sm:$0xff]   ;;  %v678_v19 = vshrl.u32 %v677_v18, 7  ;;  %s1614_s19 = sshll.u32 %s2307_s27, 7  ;;  %s1350_s0 = sshll.u32 %s2630_s20, 4  ;;  %s1351_s0 = int_to_ptr.vmem [resolvable:$true] %s1350_s0 }
  0xf0   : > { %1662 = vmatprep.subr.bf16.mxu0 %v2217_v0  ;;  %829 = vmatpush1.bf16.msra.mxu1 %v1860_v21  ;;  %v1905_v4 = vld [vmem:[#allocation8 + $0xb0] ss:$12 sps:$4 sm:$0xff]   ;;  %v1910_v10 = vld [vmem:[#allocation11 + $0x20] sm:$0xff]   ;;  %s2740_s30 = sld [smem:[#allocation25_spill]]  ;;  %s1334_s28 = scalar_lea.sflag [#allocation4], %s2536_s14 }
  0xf1   : > { %830 = vmatprep.subr.bf16.mxu1 %v1862_v22  ;;  %v1907_v7 = vld [vmem:[#allocation11 + $0x8] sm:$0xff]   ;;  %v1908_v8 = vld [vmem:[#allocation11 + $0x10] sm:$0xff]   ;;  %v1909_v9 = vld [vmem:[#allocation11 + $0x18] sm:$0xff]   ;;  %v683_v22 = vsub.s32 1, %v678_v19  ;;  %s2126_s17 = scalar_lea.vmem %s1351_s0, 128  ;;  %p2741_p4 = scmp.ne.s32.totalorder %s2728_s7, 0 }
  0xf2   : > { %v1911_v11 = vld [vmem:[#allocation11 + $0x28] sm:$0xff]   ;;  %v1912_v12 = vld [vmem:[#allocation11 + $0x30] sm:$0xff]   ;;  %v1913_v13 = vld [vmem:[#allocation11 + $0x38] sm:$0xff]   ;;  %p2127_p12 = scmp.ne.s32.totalorder %s1351_s0, %s2126_s17  ;;  %s2220_s16 = smov [#allocation14]  }
  0xf3   : > { %1663 = vmatpush3.bf16.msra.mxu0 %v1853_v20  ;;  %v679_v20 = vsub.s32 0, %v678_v19  ;;  %v675_v21 = vld [vmem:[%s2739_s25] sm:$0x7]  ;;  %s2130_s6 = sshll.u32 %s2220_s16, 4  ;;  %s2131_s6 = int_to_ptr.vmem [resolvable:$false] %s2130_s6 }
  0xf4   : > { %1664 = vmatprep.subr.bf16.mxu0 %v2217_v0  ;;  %831 = vmatpush1.bf16.msra.mxu1 %v1864_v24  ;;  %p2128_p6 = pnand %p2127_p12, %p2741_p4  ;;  %s2132_s26 = scalar_lea.vmem %s2131_s6, 256 }
  0xf5   : > { %832 = vmatprep.subr.bf16.mxu1 %v1866_v25  ;;  %p2133_p1 = scmp.lt.s32.totalorder %s1351_s0, %s2131_s6  ;;  %p2134_p3 = scmp.lt.s32.totalorder %s2132_s26, %s2126_s17 }
  0xf6   : > { %s2647_s4 = scalar_lea.hbm %s2740_s30, %s1614_s19  ;;  %p2129_p9 = pneg %p2128_p6 }
  0xf7   : > { %1665 = vmatpush3.bf16.msra.mxu0 %v1857_v23  ;;  %v680_v23 = vrot.slane %v675_v21, %v679_v20  ;;  %p2135_p8 = por %p2134_p3, %p2133_p1 }
  0xf8   : > { %1666 = vmatprep.subr.bf16.mxu0 %v2217_v0  ;;  %833 = vmatpush1.bf16.msra.mxu1 %v1868_v27 }
  0xf9   : > { %834 = vmatprep.subr.bf16.mxu1 %v1870_v30  ;;  %p2136_p13 = pnand %p2135_p8, %p2129_p9 }
  0xfb   : > { %1667 = vmatpush3.bf16.msra.mxu0 %v1861_v26  ;;  %v684_v26 = vrot.slane %v675_v21, %v683_v22 }
  0xfc   : > { %1668 = vmatprep.subr.bf16.mxu0 %v2217_v0  ;;  %835 = vmatpush1.bf16.msra.mxu1 %v1872_v31 }
  0xfd   : > { %1062 = vmatprep.subr.bf16.mxu1 %v1876_v33 }
  0xff   : > { %1669 = vmatpush3.bf16.msra.mxu0 %v1865_v28 }
 0x100   : > { %1670 = vmatprep.subr.bf16.mxu0 %v2217_v0 }
 0x103   : > { %1671 = vmatpush3.bf16.msra.mxu0 %v1869_v29 }
 0x104   : > { %1672 = vmatprep.subr.bf16.mxu0 %v2217_v0 }
 0x107   : > { %1673 = vmatpush3.bf16.msra.mxu0 %v1873_v32 }
 0x108   : > { %1678 = vmatprep.subr.bf16.mxu0 %v2217_v0 }
 0x162   : > { %v639_v62 = vpop.permute.xlu0 %638 }
 0x163   : > { %v2609_v2 = vmul.f32 %v639_v62, %v634_v63 }
 0x165   : > { %v901_v5 = vpack.c.bf16 %v2609_v2, %v2609_v2 }
 0x1bd   : > { %v627_v35 = vpop.f32.mrb[0].mxu0 }
 0x1be   : > { %v628_v36 = vadd.f32 %v1548_v34, %v627_v35  ;;  %v1656_v37 = vpop.f32.mrb[1].mxu0 }
 0x1bf   : > { %v630_v38 = vpop.f32.mrb[2].mxu0 }
 0x1c0   : > { %v633_v39 = vmax.f32 %v628_v36, 0.0  ;;  %v1657_v40 = vpop.f32.mrb[3].mxu0  ;;  %v687_v38 = vsub.s32 2, %v678_v19 }
 0x1c1   : > { %v1603_v40 = vld [vmem:[#allocation10] ss:$0 sm:$0xff] }
 0x1c2   : > { %v642_v43 = vpack.c.bf16 %v633_v39, %v633_v39 }
 0x1c4   : > { %853 = vmatmul.mubr.bf16.vlgmr.msra.gmra.mrb[0].mxu1 %v642_v43  ;;  %1675 = vmatmul.mubr.bf16.vlgmr.msra.gmra.mrb[4].mxu0 %v642_v43 }
 0x1c5   : > { %1063 = vmatpush1.bf16.msra.mxu1 %v1874_v41  ;;  %1679 = vmatpush3.bf16.msra.mxu0 %v1877_v42  ;;  %v688_v41 = vrot.slane %v675_v21, %v687_v38 }
 0x1c6   : > { %1064 = vmatprep.subr.bf16.mxu1 %v1880_v44  ;;  %1680 = vmatprep.subr.bf16.mxu0 %v2217_v0 }
 0x1c7   : > { %1094 = vmatprep.mubr.bf16.mxu1 %v2219_v1  ;;  %1694 = vmatprep.mubr.msk.bf16.mxu0 %vm2218_vm0, %v2217_v0  ;;  %v1904_v1 = vld [vmem:[#allocation8 + $0xac] ss:$12 sps:$4 sm:$0xff]  }
 0x1c9   : > { %1065 = vmatpush1.bf16.msra.mxu1 %v1878_v45  ;;  %1681 = vmatpush3.bf16.msra.mxu0 %v1881_v46 }
 0x1ca   : > { %1066 = vmatprep.subr.bf16.mxu1 %v1884_v47  ;;  %1682 = vmatprep.subr.bf16.mxu0 %v2217_v0 }
 0x1cd   : > { %1067 = vmatpush1.bf16.msra.mxu1 %v1882_v48  ;;  %1683 = vmatpush3.bf16.msra.mxu0 %v1885_v49 }
 0x1ce   : > { %1068 = vmatprep.subr.bf16.mxu1 %v1888_v50  ;;  %1684 = vmatprep.subr.bf16.mxu0 %v2217_v0 }
 0x1d1   : > { %1069 = vmatpush1.bf16.msra.mxu1 %v1886_v51  ;;  %1685 = vmatpush3.bf16.msra.mxu0 %v1889_v52 }
 0x1d2   : > { %1070 = vmatprep.subr.bf16.mxu1 %v1892_v53  ;;  %1686 = vmatprep.subr.bf16.mxu0 %v2217_v0 }
 0x1d5   : > { %1071 = vmatpush1.bf16.msra.mxu1 %v1890_v54  ;;  %1687 = vmatpush3.bf16.msra.mxu0 %v1893_v55  ;;  %v2633_v55 = vand.u32 127, %v677_v18 }
 0x1d6   : > { %1072 = vmatprep.subr.bf16.mxu1 %v1896_v56  ;;  %1688 = vmatprep.subr.bf16.mxu0 %v2217_v0  ;;  %v1604_v56 = vld [vmem:[#allocation13] ss:$0 sm:$0xff] }
 0x1d7   : > { %vm1291_vm3 = vcmp.lt.s32.totalorder %v2633_v55, 6  ;;  %vm1287_vm6 = vcmp.eq.s32.totalorder %v2633_v55, 6 }
 0x1d9   : > { %1073 = vmatpush1.bf16.msra.mxu1 %v1894_v57  ;;  %1689 = vmatpush3.bf16.msra.mxu0 %v1897_v58 }
 0x1da   : > { %1074 = vmatprep.subr.bf16.mxu1 %v1900_v59  ;;  %1690 = vmatprep.subr.bf16.mxu0 %v2217_v0 }
 0x1dd   : > { %1075 = vmatpush1.bf16.msra.mxu1 %v1898_v60  ;;  %1691 = vmatpush3.bf16.msra.mxu0 %v1901_v61 }
 0x1de   : > { %1076 = vmatprep.subr.bf16.mxu1 %v1904_v1  ;;  %1692 = vmatprep.subr.bf16.mxu0 %v2217_v0 }
 0x1e1   : > { %1077 = vmatpush1.bf16.msra.mxu1 %v1902_v3  ;;  %1693 = vmatpush3.bf16.msra.mxu0 %v1905_v4 }
 0x1e2   : > { %1698 = vmatprep.subr.bf16.mxu1 %v2217_v0 }
 0x1e4   : > { %1095 = vmatmul.mubr.bf16.vlgmr.msra.gmra.mrb[0].mxu1 %v901_v5  ;;  %1695 = vmatmul.mubr.bf16.vlgmr.msra.gmra.mrb[8].mxu0 %v901_v5 }
 0x1e5   : > { %1714 = vmatprep.mubr.msk.bf16.mxu1 %vm2218_vm0, %v2217_v0  ;;  %1699 = vmatpush3.bf16.msra.mxu1 %v1906_v6 }
 0x1e6   : > { %1700 = vmatprep.subr.bf16.mxu1 %v2217_v0 }
 0x1e9   : > { %1701 = vmatpush3.bf16.msra.mxu1 %v1907_v7 }
 0x1ea   : > { %1702 = vmatprep.subr.bf16.mxu1 %v2217_v0 }
 0x1ed   : > { %1703 = vmatpush3.bf16.msra.mxu1 %v1908_v8 }
 0x1ee   : > { %1704 = vmatprep.subr.bf16.mxu1 %v2217_v0 }
 0x1f1   : > { %1705 = vmatpush3.bf16.msra.mxu1 %v1909_v9 }
 0x1f2   : > { %1706 = vmatprep.subr.bf16.mxu1 %v2217_v0 }
 0x1f5   : > { %1707 = vmatpush3.bf16.msra.mxu1 %v1910_v10 }
 0x1f6   : > { %1708 = vmatprep.subr.bf16.mxu1 %v2217_v0 }
 0x1f9   : > { %1709 = vmatpush3.bf16.msra.mxu1 %v1911_v11 }
 0x1fa   : > { %1710 = vmatprep.subr.bf16.mxu1 %v2217_v0 }
 0x1fd   : > { %1711 = vmatpush3.bf16.msra.mxu1 %v1912_v12 }
 0x1fe   : > { %1712 = vmatprep.subr.bf16.mxu1 %v2217_v0 }
 0x201   : > { %1713 = vmatpush3.bf16.msra.mxu1 %v1913_v13 }
 0x297   : > { %v895_v14 = vpop.f32.mrb[4].mxu0 }
 0x298   : > { %v1676_v15 = vpop.f32.mrb[5].mxu0  ;;  %v896_v45 = vadd.f32 %v895_v14, %v688_v41 }
 0x299   : > { %v898_v16 = vpop.f32.mrb[6].mxu0 }
 0x29a   : > { %v1677_v17 = vpop.f32.mrb[7].mxu0 }
 0x2b7   : > { %v1096_v24 = vpop.f32.mrb[0].mxu1  ;;  %v1137_v25 = vpop.f32.mrb[8].mxu0 }
 0x2b8   : > { %v1718_v27 = vadd.f32 %v1096_v24, %v680_v23  ;;  %v1098_v28 = vpop.f32.mrb[1].mxu1  ;;  %v1696_v0 = vpop.f32.mrb[9].mxu0  ;;  %v1164_v43 = vadd.f32 %v1603_v40, %v1137_v25 }
 0x2b9   : > { %v1100_v29 = vpop.f32.mrb[2].mxu1  ;;  %v1140_v30 = vpop.f32.mrb[10].mxu0  ;;  %v1719_v34 = vadd.f32 %v1098_v28, %v684_v26 }
 0x2ba   : > { %v1601_v31 = vmul.f32 -1.442695, %v1718_v27  ;;  %v1101_v32 = vpop.f32.mrb[3].mxu1  ;;  %v1697_v33 = vpop.f32.mrb[11].mxu0 }
 0x2bb   : > { %v1602_v35 = vmul.f32 -1.442695, %v1719_v34 }
 0x2bc   : > { %1914 = vpow2.f32 %v1601_v31 }
 0x2bd   : > { %1916 = vpow2.f32 %v1602_v35 }
 0x2c6   : > { %v1915_v36 = vpop.eup %1914 }
 0x2c7   : > { %v1147_v37 = vadd.f32 1.0, %v1915_v36  ;;  %v1917_v39 = vpop.eup %1916 }
 0x2c8   : > { %v1154_v42 = vadd.f32 1.0, %v1917_v39 }
 0x2c9   : > { %1918 = vrcp.f32 %v1147_v37 }
 0x2ca   : > { %1920 = vrcp.f32 %v1154_v42 }
 0x2d3   : > { %v1919_v44 = vpop.eup %1918 }
 0x2d4   : > { %v1165_v46 = vmul.f32 %v1919_v44, %v1164_v43  ;;  %v1921_v48 = vpop.eup %1920 }
 0x2d5   : > { %v1168_v49 = vsub.f32 1.0, %v1921_v48  ;;  %v1170_v52 = vmul.f32 %v1921_v48, %v2609_v2 }
 0x2d6   : > { %v1166_v47 = vadd.f32 %v1165_v46, %v896_v45 }
 0x2d8   : > { %1922 = vtanh.f32 %v1166_v47 }
 0x2e2   : > { %v1923_v50 = vpop.eup %1922 }
 0x2e3   : > { %v1169_v51 = vmul.f32 %v1923_v50, %v1168_v49 }
 0x2e5   : > { %v1171_v53 = vadd.f32 %v1170_v52, %v1169_v51 }
 0x2e7   : > { %v1173_v54 = vpack.c.bf16 %v1171_v53, %v1171_v53  ;;  %1172 = vst [vmem:[%s2630_s20] sm:$0xff] %v1171_v53 }
 0x2e9   : > { %1715 = vmatmul.mubr.bf16.vlgmr.msra.gmra.mrb[4].mxu1 %v1173_v54 }
 0x3bc   : > { %v1279_v57 = vpop.f32.mrb[4].mxu1 }
 0x3bd   : > { %v1280_v58 = vadd.f32 %v1604_v56, %v1279_v57  ;;  %v1716_v59 = vpop.f32.mrb[5].mxu1 }
 0x3be   : > { %v1282_v60 = vpop.f32.mrb[6].mxu1 }
 0x3bf   : > { %v1717_v61 = vpop.f32.mrb[7].mxu1  ;;  %v1292_v62 = vsel %vm1291_vm3, %v1280_v58, -1e+30  ;;  %v1288_v11 = vsel %vm1287_vm6, %v1280_v58, 0.0 }
 0x3c0   : > { %1293 = vmax.xlane.f32.xlu0 %v1292_v62 }
 0x44d   : > { %v2636_v63 = vpop.xlane.xlu0 %1293 }
 0x44e   : > { %v1295_v1 = vsub.f32 %v1292_v62, %v2636_v63  ;;  %vm1304_vm4 = vcmp.ge.f32.partialorder %v1292_v62, %v2636_v63 }
 0x44f   : > { %v1305_v2 = vsel %vm1304_vm4, %v2633_v55, 128 }
 0x450   : > { %v1296_v3 = vmul.f32 1.442695, %v1295_v1  ;;  %v1307_v4 = vshra.s32 %v1305_v2, 16  ;;  %v1306_v7 = vand.u32 65535, %v1305_v2 }
 0x452   : > { %1924 = vpow2.f32 %v1296_v3  ;;  %v1309_v5 = vcvt.s32.f32 %v1307_v4  ;;  %v1308_v9 = vcvt.s32.f32 %v1306_v7 }
 0x454   : > { %1310 = vmin.xlane.f32.xlu1 %v1309_v5 }
 0x45c   : > { %v1925_v6 = vpop.eup %1924 }
 0x45d   : > { %1298 = vadd.xlane.f32.xlu1 %v1925_v6 }
 0x4e1   : > { %v1311_v8 = vpop.xlane.xlu1 %1310 }
 0x4e2   : > { %vm1312_vm5 = vcmp.eq.f32.partialorder %v1309_v5, %v1311_v8 }
 0x4e3   : > { %v1313_v10 = vsel %vm1312_vm5, %v1308_v9, inf }
 0x4e4   : > { %1314 = vmin.xlane.f32.xlu1 %v1313_v10 }
 0x4e8   : > { %1289 = vadd.xlane.f32.xlu1 %v1288_v11 }
 0x4e9   : > { %2139 = shalt.err (!%p2136_p13)
}
 0x4ea   : > { %s2140_s27 = scalar_lea.hbm %s2647_s4, 128  ;;  %s2144_s20 = scalar_lea.hbm %s2740_s30, 384 }
 0x4eb   : > { %p2141_p0 = scmp.ne.s32.totalorder %s2647_s4, %s2140_s27  ;;  %p2145_p10 = scmp.lt.u32.totalorder %s2647_s4, %s2740_s30 }
 0x4ec   : > { %p2146_p11 = scmp.lt.u32.totalorder %s2144_s20, %s2140_s27  ;;  %p2148_p12 = scmp.lt.u32.totalorder %s2140_s27, %s2647_s4 }
 0x4ed   : > { %p2142_p2 = pnand %p2141_p0, %p2741_p4 }
 0x4ee   : > { %p2147_p5 = por %p2146_p11, %p2145_p10 }
 0x4ef   : > { %p2143_p7 = pneg %p2142_p2 }
 0x4f0   : > { %p2149_p6 = por %p2148_p12, %p2147_p5 }
 0x4f2   : > { %p2150_p9 = pnand %p2149_p6, %p2143_p7 }
 0x4f4   : > { %2153 = shalt.err (!%p2150_p9)
}
 0x4f5   : > { %1750 = dma.vmem_to_hbm [thread:$0]  (%p2741_p4), %s1351_s0, 128, %s2647_s4, %s1334_s28   ;;  %v1299_v12 = vpop.xlane.xlu1 %1298  ;;  %v1317_v14 = vcvt.f32.s32 %v1311_v8  ;;  %vm1323_vm7 = vcmp.eq.s32.totalorder %v2633_v55, 2  ;;  %vm1322_vm8 = vcmp.eq.s32.totalorder %v2633_v55, 1  ;;  %vm1321_vm9 = vcmp.eq.s32.totalorder %v2633_v55, 0 }
 0x4f6   : > { %1926 = vlog2.f32 %v1299_v12  ;;  %s2742_s29 = sld [smem:[#allocation24_spill]]  ;;  %vm1327_vm10 = vcmask 64512  }
 0x4f7   : > { %v1318_v17 = vshll.u32 %v1317_v14, 16 }
 0x4fc   : > { %s554_s4 = scalar_lea.vmem %s2742_s29, %s2567_s12 }
 0x500   : > { %v1927_v13 = vpop.eup %1926 }
 0x501   : > { %v1301_v15 = vmul.f32 0.6931472, %v1927_v13 }
 0x503   : > { %v1302_v19 = vadd.f32 %v1301_v15, %v2636_v63 }
 0x505   : > { %v1303_v22 = vsub.f32 %v2636_v63, %v1302_v19 }
 0x571   : > { %v1315_v16 = vpop.xlane.xlu1 %1314 }
 0x572   : > { %v1316_v18 = vcvt.f32.s32 %v1315_v16 }
 0x574   : > { %v1319_v20 = vadd.s32 %v1318_v17, %v1316_v18 }
 0x575   : > { %v1290_v25 = vpop.xlane.xlu1 %1289 }
 0x576   : > { %v1320_v21 = vcvt.s32.f32 %v1319_v20 }
 0x578   : > { %v1324_v23 = vsel %vm1323_vm7, %v1320_v21, 0.0 }
 0x579   : > { %v1325_v24 = vsel %vm1322_vm8, %v1303_v22, %v1324_v23 }
 0x57a   : > { %v1326_v26 = vsel %vm1321_vm9, %v1290_v25, %v1325_v24 }
 0x57b   : > { %1328 = vst.msk [vmem:[%s554_s4] sm:$0xff] %vm1327_vm10, %v1326_v26 }
 0x57c PF: > { %p1792_p4 = scmp.ge.s32.totalorder %s2204_s24, 2  ;;  %s1369_s28 = sand.u32 1, %s2192_s21  }
 0x57d   : > { %p2743_p1 = scmp.ne.s32.totalorder %s2729_s11, 0  ;;  %s1370_s17 = scalar_lea.sflag [#allocation4], %s1369_s28 }
 0x57f   : > { %p1776_p3 = pnand %p1792_p4, %p2743_p1 }
 0x581   : > { %2187 = dma.done.wait (!%p1776_p3), %s1370_s17, 128  }
 0x582   : > { %2189 = vsyncadd (!%p1776_p3), %s1370_s17, 4294967168  ;;  %p29_p8 = scmp.ge.s32.totalorder %s2460_s13, 5   ;;  %s2744_s21 = smov %s2196_s22 }
 0x583   : > { %s2745_s22 = smov %s2200_s23  ;;  %s2746_s23 = smov %s2471_s15 }
 0x584   : > { %s2747_s24 = smov %s2460_s13  ;;  %31 = sbr.rel (!%p29_p8) target bundleno = 15 (0xf), region = 151 }
 0x58b   :  { %1375 = vsyncpa [#allocation3], 1 }
 0x58c   :  { %1377 = vsyncpa [#allocation3 + $0x1], 1 }
 0x58d   :  { %1378 = vsyncpa [#allocation6], 1 }
 0x58e   :  { %1379 = vsyncpa [#allocation9], 1 }
 0x58f   :  { %1380 = vsyncpa [#allocation12], 1 }
 0x590   :  { %1381 = vsyncpa [#allocation4], 1 }
 0x591   :  { %1383 = vsyncpa [#allocation4 + $0x1], 1 }

</bundles_post_ra>
